<compile_context>
chip_gen: v7x
topology: tpu7x:2x2x1
jax: 0.10.0
libtpu: 0.0.40
codegen_flags: <defaults>
</compile_context>

<pallas_src>
import jax
import jax.numpy as jnp
from jax.experimental import pallas as pl
from jax.experimental.pallas import tpu as pltpu


# ---------------------------------------------------------------------------
# Config (synthetic, mirrors the undefined `Config()` in net.py)
# ---------------------------------------------------------------------------
N_INPUT = 16
N_HIDDEN = 32
N_HIDDEN_LAYER = 3
N_OUTPUT = 8
B_INIT = 0.1
BN_EPS = 1e-5
BATCH = 8                      # small demo batch (multiple of 8 sublanes)
# ACTIVATION = relu

LANE = 128                                           # uniform padded width
N_VEC_ROWS = 2 + 3 * N_HIDDEN_LAYER + 1              # 12 vector rows
VEC_ROWS_PAD = ((N_VEC_ROWS + 7) // 8) * 8           # 16 (sublane aligned)
W_SLAB_ROWS = (N_HIDDEN_LAYER + 1) * LANE            # 512


# ---------------------------------------------------------------------------
# Kernel
# ---------------------------------------------------------------------------
def _bn_train_fused(x, gamma, beta, eps=BN_EPS):
    """BatchNorm1d training-mode forward.

    One-pass statistics: sum(x) and sum(x*x) are independent reductions
    (var = E[x^2] - mean^2); normalize + affine are fused into a single
    scale/shift pass:  y = x * s + t.
    Zero-padded feature columns (gamma = 0) stay exactly zero.
    """
    inv_n = 1.0 / x.shape[0]
    s1 = jnp.sum(x, axis=0, keepdims=True)
    s2 = jnp.sum(x * x, axis=0, keepdims=True)
    mean = s1 * inv_n
    var = jnp.maximum(s2 * inv_n - mean * mean, 0.0)
    scale = gamma * jax.lax.rsqrt(var + eps)
    shift = beta - mean * scale
    return x * scale + shift


def _mlp_kernel(x_ref, w_ref, vec_ref, out_ref):
    """Whole-network forward, all operands resident in VMEM.

    x_ref   : (B, LANE)              input, zero-padded past N_INPUT
    w_ref   : (W_SLAB_ROWS, LANE)    [W0; W1; W2; W_pred] (zero-padded)
    vec_ref : (VEC_ROWS_PAD, LANE)   rows: bn_in gamma/beta,
                                     (b, gamma, beta) per hidden layer, b_pred
    out_ref : (B, LANE)              padded output (crop to N_OUTPUT outside)
    """
    x = x_ref[...]
    vecs = vec_ref[...]

    # input BatchNorm1d
    x = _bn_train_fused(x, vecs[0:1, :], vecs[1:2, :])

    # hidden layers: Linear -> BatchNorm1d -> ReLU
    # (NB: the Linear bias is mathematically cancelled by the batch-mean
    #  subtraction of the following BN, but it is one free VPU add so we keep
    #  it for exact parity with the reference.)
    for i in range(N_HIDDEN_LAYER):
        w = w_ref[i * LANE:(i + 1) * LANE, :]          # 128-row aligned slice
        r = 2 + 3 * i
        h = jnp.dot(x, w, preferred_element_type=jnp.float32) + vecs[r:r + 1, :]
        h = _bn_train_fused(h, vecs[r + 1:r + 2, :], vecs[r + 2:r + 3, :])
        x = jnp.maximum(h, 0.0)   # ACTIVATION = relu

    # predict layer (columns >= N_OUTPUT of W/b are zero)
    wp = w_ref[N_HIDDEN_LAYER * LANE:(N_HIDDEN_LAYER + 1) * LANE, :]
    bp = vecs[2 + 3 * N_HIDDEN_LAYER:3 + 3 * N_HIDDEN_LAYER, :]
    out = jnp.dot(x, wp, preferred_element_type=jnp.float32) + bp
    out_ref[...] = out.astype(out_ref.dtype)


# ---------------------------------------------------------------------------
# Parameters (synthetic init mirroring Net.__init__) and packing
# ---------------------------------------------------------------------------
def make_params(key):
    """Linear W ~ N(0, 0.1), biases = B_INIT, BN gamma=1 / beta=0 (fresh)."""
    params = {}
    params["bn_in_gamma"] = jnp.ones((1, N_INPUT), jnp.float32)
    params["bn_in_beta"] = jnp.zeros((1, N_INPUT), jnp.float32)
    keys = jax.random.split(key, N_HIDDEN_LAYER + 1)
    layers = []
    for i in range(N_HIDDEN_LAYER):
        in_size = N_INPUT if i == 0 else N_HIDDEN
        w = 0.1 * jax.random.normal(keys[i], (in_size, N_HIDDEN), jnp.float32)
        b = jnp.full((1, N_HIDDEN), B_INIT, jnp.float32)
        gamma = jnp.ones((1, N_HIDDEN), jnp.float32)
        beta = jnp.zeros((1, N_HIDDEN), jnp.float32)
        layers.append((w, b, gamma, beta))
    params["layers"] = layers
    params["w_pred"] = 0.1 * jax.random.normal(
        keys[-1], (N_HIDDEN, N_OUTPUT), jnp.float32)
    params["b_pred"] = jnp.full((1, N_OUTPUT), B_INIT, jnp.float32)
    return params


def _pad_to(a, rows, cols):
    return jnp.pad(a, ((0, rows - a.shape[0]), (0, cols - a.shape[1])))


def pack_params(params):
    """Pack all weights into one (512, 128) slab and all per-feature vectors
    into one (16, 128) slab -> 2 parameter DMAs total."""
    w_blocks = [_pad_to(w, LANE, LANE) for (w, _, _, _) in params["layers"]]
    w_blocks.append(_pad_to(params["w_pred"], LANE, LANE))
    w_slab = jnp.concatenate(w_blocks, axis=0)               # (512, 128)

    vec_rows = [
        _pad_to(params["bn_in_gamma"], 1, LANE),
        _pad_to(params["bn_in_beta"], 1, LANE),
    ]
    for (_, b, g, be) in params["layers"]:
        vec_rows += [_pad_to(b, 1, LANE),
                     _pad_to(g, 1, LANE),
                     _pad_to(be, 1, LANE)]
    vec_rows.append(_pad_to(params["b_pred"], 1, LANE))
    vec_slab = jnp.concatenate(vec_rows, axis=0)
    vec_slab = jnp.pad(vec_slab,
                       ((0, VEC_ROWS_PAD - vec_slab.shape[0]), (0, 0)))
    return w_slab, vec_slab                                  # (16, 128)


# ---------------------------------------------------------------------------
# Pallas wrapper
# ---------------------------------------------------------------------------
@jax.jit
def net_forward(x, w_slab, vec_slab):
    batch = x.shape[0]
    x_pad = jnp.pad(x, ((0, 0), (0, LANE - N_INPUT)))
    vmem = pl.BlockSpec(memory_space=pltpu.MemorySpace.VMEM)
    out_pad = pl.pallas_call(
        _mlp_kernel,
        out_shape=jax.ShapeDtypeStruct((batch, LANE), jnp.float32),
        in_specs=[vmem, vmem, vmem],
        out_specs=vmem,
    )(x_pad, w_slab, vec_slab)
    return out_pad[:, :N_OUTPUT]


# ---------------------------------------------------------------------------
# Pure-JAX reference (unfused two-pass BN) for correctness checking
# ---------------------------------------------------------------------------
def _bn_ref(x, gamma, beta, eps=BN_EPS):
    mean = jnp.mean(x, axis=0, keepdims=True)
    var = jnp.mean((x - mean) * (x - mean), axis=0, keepdims=True)
    return (x - mean) * jax.lax.rsqrt(var + eps) * gamma + beta


def net_forward_ref(x, params):
    h = _bn_ref(x, params["bn_in_gamma"], params["bn_in_beta"])
    for (w, b, g, be) in params["layers"]:
        h = h @ w + b
        h = _bn_ref(h, g, be)
        h = jnp.maximum(h, 0.0)
    return h @ params["w_pred"] + params["b_pred"]


if __name__ == "__main__":
    key = jax.random.PRNGKey(0)
    kx, kp = jax.random.split(key)
    x = jax.random.normal(kx, (BATCH, N_INPUT), jnp.float32)
    params = make_params(kp)
    w_slab, vec_slab = pack_params(params)

    out = net_forward(x, w_slab, vec_slab)
    out = jax.block_until_ready(out)

    ref = net_forward_ref(x, params)
    assert out.shape == (BATCH, N_OUTPUT), out.shape
    assert jnp.allclose(out, ref, atol=1e-4, rtol=1e-4), (
        float(jnp.max(jnp.abs(out - ref))))

    print("KERNEL_OK")
</pallas_src>

<mosaic_0001>
module attributes {stable_mosaic.version = 11 : i64} {
  func.func @_mlp_kernel(%arg0: memref<8x128xf32, #tpu.memory_space<vmem>>, %arg1: memref<512x128xf32, #tpu.memory_space<vmem>>, %arg2: memref<16x128xf32, #tpu.memory_space<vmem>>, %arg3: memref<8x128xf32, #tpu.memory_space<vmem>>) attributes {dimension_semantics = [], scalar_prefetch = 0 : i64, scratch_operands = 0 : i64, tpu.core_type = #tpu.core_type<tc>} {
    %c0 = arith.constant 0 : index
    %c0_0 = arith.constant 0 : index
    %0 = vector.load %arg0[%c0, %c0_0] : memref<8x128xf32, #tpu.memory_space<vmem>>, vector<8x128xf32>
    %c0_1 = arith.constant 0 : index
    %c0_2 = arith.constant 0 : index
    %1 = vector.load %arg2[%c0_1, %c0_2] : memref<16x128xf32, #tpu.memory_space<vmem>>, vector<16x128xf32>
    %2 = vector.extract_strided_slice %1 {offsets = [0, 0], sizes = [1, 128], strides = [1, 1]} : vector<16x128xf32> to vector<1x128xf32>
    %3 = vector.extract_strided_slice %1 {offsets = [1, 0], sizes = [1, 128], strides = [1, 1]} : vector<16x128xf32> to vector<1x128xf32>
    %cst = arith.constant dense<0.000000e+00> : vector<128xf32>
    %4 = vector.multi_reduction <add>, %0, %cst [0] : vector<8x128xf32> to vector<128xf32>
    %5 = vector.shape_cast %4 : vector<128xf32> to vector<1x128xf32>
    %6 = arith.mulf %0, %0 : vector<8x128xf32>
    %cst_3 = arith.constant dense<0.000000e+00> : vector<128xf32>
    %7 = vector.multi_reduction <add>, %6, %cst_3 [0] : vector<8x128xf32> to vector<128xf32>
    %8 = vector.shape_cast %7 : vector<128xf32> to vector<1x128xf32>
    %cst_4 = arith.constant 1.250000e-01 : f32
    %9 = vector.broadcast %cst_4 : f32 to vector<1x128xf32>
    %10 = arith.mulf %5, %9 : vector<1x128xf32>
    %cst_5 = arith.constant 1.250000e-01 : f32
    %11 = vector.broadcast %cst_5 : f32 to vector<1x128xf32>
    %12 = arith.mulf %8, %11 : vector<1x128xf32>
    %13 = arith.mulf %10, %10 : vector<1x128xf32>
    %14 = arith.subf %12, %13 : vector<1x128xf32>
    %cst_6 = arith.constant 0.000000e+00 : f32
    %15 = vector.broadcast %cst_6 : f32 to vector<1x128xf32>
    %16 = arith.maximumf %14, %15 : vector<1x128xf32>
    %cst_7 = arith.constant 9.99999974E-6 : f32
    %17 = vector.broadcast %cst_7 : f32 to vector<1x128xf32>
    %18 = arith.addf %16, %17 : vector<1x128xf32>
    %19 = math.rsqrt %18 : vector<1x128xf32>
    %20 = arith.mulf %2, %19 : vector<1x128xf32>
    %21 = arith.mulf %10, %20 : vector<1x128xf32>
    %22 = arith.subf %3, %21 : vector<1x128xf32>
    %23 = vector.broadcast %20 : vector<1x128xf32> to vector<8x128xf32>
    %24 = arith.mulf %0, %23 : vector<8x128xf32>
    %25 = vector.broadcast %22 : vector<1x128xf32> to vector<8x128xf32>
    %26 = arith.addf %24, %25 : vector<8x128xf32>
    %c0_8 = arith.constant 0 : index
    %c0_9 = arith.constant 0 : index
    %27 = vector.load %arg1[%c0_8, %c0_9] : memref<512x128xf32, #tpu.memory_space<vmem>>, vector<128x128xf32>
    %cst_10 = arith.constant dense<0.000000e+00> : vector<8x128xf32>
    %28 = tpu.matmul %26, %27, %cst_10 {dimension_numbers = #tpu.dot_dimension_numbers<[1], [0], [0], [1], [0, 0, 1, 1], [], []>} : vector<8x128xf32>, vector<128x128xf32>, vector<8x128xf32> -> vector<8x128xf32>
    %29 = vector.extract_strided_slice %1 {offsets = [2, 0], sizes = [1, 128], strides = [1, 1]} : vector<16x128xf32> to vector<1x128xf32>
    %30 = vector.broadcast %29 : vector<1x128xf32> to vector<8x128xf32>
    %31 = arith.addf %28, %30 : vector<8x128xf32>
    %32 = vector.extract_strided_slice %1 {offsets = [3, 0], sizes = [1, 128], strides = [1, 1]} : vector<16x128xf32> to vector<1x128xf32>
    %33 = vector.extract_strided_slice %1 {offsets = [4, 0], sizes = [1, 128], strides = [1, 1]} : vector<16x128xf32> to vector<1x128xf32>
    %cst_11 = arith.constant dense<0.000000e+00> : vector<128xf32>
    %34 = vector.multi_reduction <add>, %31, %cst_11 [0] : vector<8x128xf32> to vector<128xf32>
    %35 = vector.shape_cast %34 : vector<128xf32> to vector<1x128xf32>
    %36 = arith.mulf %31, %31 : vector<8x128xf32>
    %cst_12 = arith.constant dense<0.000000e+00> : vector<128xf32>
    %37 = vector.multi_reduction <add>, %36, %cst_12 [0] : vector<8x128xf32> to vector<128xf32>
    %38 = vector.shape_cast %37 : vector<128xf32> to vector<1x128xf32>
    %cst_13 = arith.constant 1.250000e-01 : f32
    %39 = vector.broadcast %cst_13 : f32 to vector<1x128xf32>
    %40 = arith.mulf %35, %39 : vector<1x128xf32>
    %cst_14 = arith.constant 1.250000e-01 : f32
    %41 = vector.broadcast %cst_14 : f32 to vector<1x128xf32>
    %42 = arith.mulf %38, %41 : vector<1x128xf32>
    %43 = arith.mulf %40, %40 : vector<1x128xf32>
    %44 = arith.subf %42, %43 : vector<1x128xf32>
    %cst_15 = arith.constant 0.000000e+00 : f32
    %45 = vector.broadcast %cst_15 : f32 to vector<1x128xf32>
    %46 = arith.maximumf %44, %45 : vector<1x128xf32>
    %cst_16 = arith.constant 9.99999974E-6 : f32
    %47 = vector.broadcast %cst_16 : f32 to vector<1x128xf32>
    %48 = arith.addf %46, %47 : vector<1x128xf32>
    %49 = math.rsqrt %48 : vector<1x128xf32>
    %50 = arith.mulf %32, %49 : vector<1x128xf32>
    %51 = arith.mulf %40, %50 : vector<1x128xf32>
    %52 = arith.subf %33, %51 : vector<1x128xf32>
    %53 = vector.broadcast %50 : vector<1x128xf32> to vector<8x128xf32>
    %54 = arith.mulf %31, %53 : vector<8x128xf32>
    %55 = vector.broadcast %52 : vector<1x128xf32> to vector<8x128xf32>
    %56 = arith.addf %54, %55 : vector<8x128xf32>
    %cst_17 = arith.constant 0.000000e+00 : f32
    %57 = vector.broadcast %cst_17 : f32 to vector<8x128xf32>
    %58 = arith.maximumf %56, %57 : vector<8x128xf32>
    %c128 = arith.constant 128 : index
    %c0_18 = arith.constant 0 : index
    %59 = vector.load %arg1[%c128, %c0_18] : memref<512x128xf32, #tpu.memory_space<vmem>>, vector<128x128xf32>
    %cst_19 = arith.constant dense<0.000000e+00> : vector<8x128xf32>
    %60 = tpu.matmul %58, %59, %cst_19 {dimension_numbers = #tpu.dot_dimension_numbers<[1], [0], [0], [1], [0, 0, 1, 1], [], []>} : vector<8x128xf32>, vector<128x128xf32>, vector<8x128xf32> -> vector<8x128xf32>
    %61 = vector.extract_strided_slice %1 {offsets = [5, 0], sizes = [1, 128], strides = [1, 1]} : vector<16x128xf32> to vector<1x128xf32>
    %62 = vector.broadcast %61 : vector<1x128xf32> to vector<8x128xf32>
    %63 = arith.addf %60, %62 : vector<8x128xf32>
    %64 = vector.extract_strided_slice %1 {offsets = [6, 0], sizes = [1, 128], strides = [1, 1]} : vector<16x128xf32> to vector<1x128xf32>
    %65 = vector.extract_strided_slice %1 {offsets = [7, 0], sizes = [1, 128], strides = [1, 1]} : vector<16x128xf32> to vector<1x128xf32>
    %cst_20 = arith.constant dense<0.000000e+00> : vector<128xf32>
    %66 = vector.multi_reduction <add>, %63, %cst_20 [0] : vector<8x128xf32> to vector<128xf32>
    %67 = vector.shape_cast %66 : vector<128xf32> to vector<1x128xf32>
    %68 = arith.mulf %63, %63 : vector<8x128xf32>
    %cst_21 = arith.constant dense<0.000000e+00> : vector<128xf32>
    %69 = vector.multi_reduction <add>, %68, %cst_21 [0] : vector<8x128xf32> to vector<128xf32>
    %70 = vector.shape_cast %69 : vector<128xf32> to vector<1x128xf32>
    %cst_22 = arith.constant 1.250000e-01 : f32
    %71 = vector.broadcast %cst_22 : f32 to vector<1x128xf32>
    %72 = arith.mulf %67, %71 : vector<1x128xf32>
    %cst_23 = arith.constant 1.250000e-01 : f32
    %73 = vector.broadcast %cst_23 : f32 to vector<1x128xf32>
    %74 = arith.mulf %70, %73 : vector<1x128xf32>
    %75 = arith.mulf %72, %72 : vector<1x128xf32>
    %76 = arith.subf %74, %75 : vector<1x128xf32>
    %cst_24 = arith.constant 0.000000e+00 : f32
    %77 = vector.broadcast %cst_24 : f32 to vector<1x128xf32>
    %78 = arith.maximumf %76, %77 : vector<1x128xf32>
    %cst_25 = arith.constant 9.99999974E-6 : f32
    %79 = vector.broadcast %cst_25 : f32 to vector<1x128xf32>
    %80 = arith.addf %78, %79 : vector<1x128xf32>
    %81 = math.rsqrt %80 : vector<1x128xf32>
    %82 = arith.mulf %64, %81 : vector<1x128xf32>
    %83 = arith.mulf %72, %82 : vector<1x128xf32>
    %84 = arith.subf %65, %83 : vector<1x128xf32>
    %85 = vector.broadcast %82 : vector<1x128xf32> to vector<8x128xf32>
    %86 = arith.mulf %63, %85 : vector<8x128xf32>
    %87 = vector.broadcast %84 : vector<1x128xf32> to vector<8x128xf32>
    %88 = arith.addf %86, %87 : vector<8x128xf32>
    %cst_26 = arith.constant 0.000000e+00 : f32
    %89 = vector.broadcast %cst_26 : f32 to vector<8x128xf32>
    %90 = arith.maximumf %88, %89 : vector<8x128xf32>
    %c256 = arith.constant 256 : index
    %c0_27 = arith.constant 0 : index
    %91 = vector.load %arg1[%c256, %c0_27] : memref<512x128xf32, #tpu.memory_space<vmem>>, vector<128x128xf32>
    %cst_28 = arith.constant dense<0.000000e+00> : vector<8x128xf32>
    %92 = tpu.matmul %90, %91, %cst_28 {dimension_numbers = #tpu.dot_dimension_numbers<[1], [0], [0], [1], [0, 0, 1, 1], [], []>} : vector<8x128xf32>, vector<128x128xf32>, vector<8x128xf32> -> vector<8x128xf32>
    %93 = vector.extract_strided_slice %1 {offsets = [8, 0], sizes = [1, 128], strides = [1, 1]} : vector<16x128xf32> to vector<1x128xf32>
    %94 = vector.broadcast %93 : vector<1x128xf32> to vector<8x128xf32>
    %95 = arith.addf %92, %94 : vector<8x128xf32>
    %96 = vector.extract_strided_slice %1 {offsets = [9, 0], sizes = [1, 128], strides = [1, 1]} : vector<16x128xf32> to vector<1x128xf32>
    %97 = vector.extract_strided_slice %1 {offsets = [10, 0], sizes = [1, 128], strides = [1, 1]} : vector<16x128xf32> to vector<1x128xf32>
    %cst_29 = arith.constant dense<0.000000e+00> : vector<128xf32>
    %98 = vector.multi_reduction <add>, %95, %cst_29 [0] : vector<8x128xf32> to vector<128xf32>
    %99 = vector.shape_cast %98 : vector<128xf32> to vector<1x128xf32>
    %100 = arith.mulf %95, %95 : vector<8x128xf32>
    %cst_30 = arith.constant dense<0.000000e+00> : vector<128xf32>
    %101 = vector.multi_reduction <add>, %100, %cst_30 [0] : vector<8x128xf32> to vector<128xf32>
    %102 = vector.shape_cast %101 : vector<128xf32> to vector<1x128xf32>
    %cst_31 = arith.constant 1.250000e-01 : f32
    %103 = vector.broadcast %cst_31 : f32 to vector<1x128xf32>
    %104 = arith.mulf %99, %103 : vector<1x128xf32>
    %cst_32 = arith.constant 1.250000e-01 : f32
    %105 = vector.broadcast %cst_32 : f32 to vector<1x128xf32>
    %106 = arith.mulf %102, %105 : vector<1x128xf32>
    %107 = arith.mulf %104, %104 : vector<1x128xf32>
    %108 = arith.subf %106, %107 : vector<1x128xf32>
    %cst_33 = arith.constant 0.000000e+00 : f32
    %109 = vector.broadcast %cst_33 : f32 to vector<1x128xf32>
    %110 = arith.maximumf %108, %109 : vector<1x128xf32>
    %cst_34 = arith.constant 9.99999974E-6 : f32
    %111 = vector.broadcast %cst_34 : f32 to vector<1x128xf32>
    %112 = arith.addf %110, %111 : vector<1x128xf32>
    %113 = math.rsqrt %112 : vector<1x128xf32>
    %114 = arith.mulf %96, %113 : vector<1x128xf32>
    %115 = arith.mulf %104, %114 : vector<1x128xf32>
    %116 = arith.subf %97, %115 : vector<1x128xf32>
    %117 = vector.broadcast %114 : vector<1x128xf32> to vector<8x128xf32>
    %118 = arith.mulf %95, %117 : vector<8x128xf32>
    %119 = vector.broadcast %116 : vector<1x128xf32> to vector<8x128xf32>
    %120 = arith.addf %118, %119 : vector<8x128xf32>
    %cst_35 = arith.constant 0.000000e+00 : f32
    %121 = vector.broadcast %cst_35 : f32 to vector<8x128xf32>
    %122 = arith.maximumf %120, %121 : vector<8x128xf32>
    %c384 = arith.constant 384 : index
    %c0_36 = arith.constant 0 : index
    %123 = vector.load %arg1[%c384, %c0_36] : memref<512x128xf32, #tpu.memory_space<vmem>>, vector<128x128xf32>
    %124 = vector.extract_strided_slice %1 {offsets = [11, 0], sizes = [1, 128], strides = [1, 1]} : vector<16x128xf32> to vector<1x128xf32>
    %cst_37 = arith.constant dense<0.000000e+00> : vector<8x128xf32>
    %125 = tpu.matmul %122, %123, %cst_37 {dimension_numbers = #tpu.dot_dimension_numbers<[1], [0], [0], [1], [0, 0, 1, 1], [], []>} : vector<8x128xf32>, vector<128x128xf32>, vector<8x128xf32> -> vector<8x128xf32>
    %126 = vector.broadcast %124 : vector<1x128xf32> to vector<8x128xf32>
    %127 = arith.addf %125, %126 : vector<8x128xf32>
    %c0_38 = arith.constant 0 : index
    %c0_39 = arith.constant 0 : index
    %128 = vector.load %arg3[%c0_38, %c0_39] : memref<8x128xf32, #tpu.memory_space<vmem>>, vector<8x128xf32>
    tpu.vector_store %arg3[%c0_38, %c0_39], %127 {strides = array<i32>} : memref<8x128xf32, #tpu.memory_space<vmem>>, vector<8x128xf32>,
    return
  }
}

</mosaic_0001>

<bundles_post_ra>
// kernel: net_forward.1
= control target key start
LH: loop header
LB: loop body
LE: loop exit
PB: predicated region body
PF: predicated region fallthrough
CT: control target
= control target key end

     0   :  { %8 = vsyncpa [#allocation3], 0  ;;  %s1058_s0 = inlined_call_operand.vmem [shape: f32[8,128], index: 0, kind: input, shape index: {}]   ;;  %s1059_s1 = inlined_call_operand.hbm [shape: f32[512,128], index: 1, kind: input, shape index: {}]   ;;  %s1060_s2 = inlined_call_operand.vmem [shape: f32[16,128], index: 2, kind: input, shape index: {}]   ;;  %s1061_s3 = inlined_call_operand.hbm [shape: f32[8,128], index: 3, kind: output, shape index: {}]  }
   0x1   :  { %9 = vsyncpa [#allocation4], 0  ;;  %s922_s12 = smov [#allocation2]   ;;  %s874_s16 = scalar_lea.hbm %s1059_s1, 8192 }
   0x2   :  { %s17_s13 = sshll.u32 %s922_s12, 4  ;;  %p875_p0 = scmp.ne.s32.totalorder %s1059_s1, %s874_s16  ;;  %s18_s13 = int_to_ptr.vmem [resolvable:$true] %s17_s13 }
   0x3   :  { %p878_p1 = scmp.lt.u32.totalorder %s874_s16, %s1059_s1 }
   0x5   :  { %p880_p2 = pnand %p878_p1, %p875_p0 }
   0x7   :  { %883 = shalt.err (!%p880_p2)
}
   0x8   :  { %s884_s21 = scalar_lea.vmem %s18_s13, 8192  ;;  %p889_p4 = scmp.lt.s32.totalorder %s18_s13, %s18_s13 }
   0x9   :  { %p885_p3 = scmp.ne.s32.totalorder %s18_s13, %s884_s21  ;;  %p890_p5 = scmp.lt.s32.totalorder %s884_s21, %s884_s21 }
   0xb   :  { %p891_p6 = por %p890_p5, %p889_p4 }
   0xd   :  { %p892_p7 = pnand %p891_p6, %p885_p3 }
   0xf   :  { %895 = shalt.err (!%p892_p7)
}
  0x10   :  { %s923_s22 = smov 128   ;;  %s924_s23 = smov 8  }
  0x11   :  { %23 = dma.hbm_to_vmem [thread:$0]  %s1059_s1, 8192, %s18_s13, [#allocation3], %s923_s22, %s923_s22, %s924_s23  }
  0x12   :  { %918 = dma.done.wait [#allocation3], 8192  }
  0x13   :  { %919 = vsyncadd [#allocation3], 4294959104  ;;  %v925_v0 = vmov 0.0|0.0   ;;  %vm926_vm0 = vmmov 0   ;;  %v927_v1 = vmov 0.0   ;;  %v68_v2 = vld [vmem:[#allocation2] sm:$0xff]  ;;  %v58_v46 = vlaneseq }
  0x14   :  { %763 = vmatprep.subr.bf16.mxu0 %v925_v0  ;;  %655 = vmatprep.mubr.msk.f32.mxu0 %vm926_vm0, %v927_v1  ;;  %v69_v3 = vld [vmem:[#allocation2 + $0x8] sm:$0xff]  ;;  %v70_v4 = vld [vmem:[#allocation2 + $0x10] sm:$0xff]  ;;  %v71_v6 = vld [vmem:[#allocation2 + $0x18] sm:$0xff] }
  0x15   :  { %787 = vmatprep.subr.bf16.mxu1 %v925_v0  ;;  %690 = vmatprep.mubr.msk.f32.mxu1 %vm926_vm0, %v927_v1  ;;  %v764_v5 = vpack.c.bf16 %v69_v3, %v68_v2  ;;  %v767_v7 = vpack.c.bf16 %v71_v6, %v70_v4  ;;  %v72_v8 = vld [vmem:[#allocation2 + $0x20] sm:$0xff]  ;;  %v73_v9 = vld [vmem:[#allocation2 + $0x28] sm:$0xff]  ;;  %v74_v14 = vld [vmem:[#allocation2 + $0x30] sm:$0xff]  ;;  %v978_v47 = vshrl.u32 %v58_v46, 7 }
  0x16   :  { %v29_v10 = vld [vmem:[%s1058_s0] sm:$0xff]  ;;  %v770_v13 = vpack.c.bf16 %v73_v9, %v72_v8  ;;  %v75_v15 = vld [vmem:[#allocation2 + $0x38] sm:$0xff]  ;;  %v76_v21 = vld [vmem:[#allocation2 + $0x40] sm:$0xff] }
  0x17   :  { %765 = vmatpush3.bf16.msra.mxu0 %v764_v5  ;;  %v32_v11 = vrot.slane %v29_v10, 4  ;;  %v38_v12 = vmul.f32 %v29_v10, %v29_v10  ;;  %v773_v20 = vpack.c.bf16 %v75_v15, %v74_v14  ;;  %v77_v22 = vld [vmem:[#allocation2 + $0x48] sm:$0xff]  ;;  %v78_v28 = vld [vmem:[#allocation2 + $0x50] sm:$0xff]  ;;  %v79_v29 = vld [vmem:[#allocation2 + $0x58] sm:$0xff]  ;;  %v60_v49 = vsub.s32 0, %v978_v47 }
  0x18   :  { %766 = vmatprep.subr.bf16.mxu0 %v925_v0  ;;  %v776_v27 = vpack.c.bf16 %v77_v22, %v76_v21  ;;  %v779_v34 = vpack.c.bf16 %v79_v29, %v78_v28  ;;  %v80_v35 = vld [vmem:[#allocation2 + $0x60] sm:$0xff]  ;;  %v81_v36 = vld [vmem:[#allocation2 + $0x68] sm:$0xff]  ;;  %v82_v41 = vld [vmem:[#allocation2 + $0x70] sm:$0xff]  ;;  %v65_v55 = vsub.s32 1, %v978_v47  ;;  %v86_v22 = vsub.s32 2, %v978_v47 }
  0x19   :  { %v33_v16 = vadd.f32 %v32_v11, %v29_v10  ;;  %v39_v17 = vrot.slane %v38_v12, 4  ;;  %v782_v40 = vpack.c.bf16 %v81_v36, %v80_v35  ;;  %v83_v42 = vld [vmem:[#allocation2 + $0x78] sm:$0xff]  ;;  %v983_v48 = vld [vmem:[%s1060_s2] sm:$0xff]  ;;  %v195_v60 = vld [vmem:[#allocation2 + $0x80] sm:$0xff] }
  0x1a   :  { %v785_v45 = vpack.c.bf16 %v83_v42, %v82_v41  ;;  %v196_v61 = vld [vmem:[#allocation2 + $0x88] sm:$0xff]  ;;  %v197_v63 = vld [vmem:[#allocation2 + $0x90] sm:$0xff]  ;;  %v198_v2 = vld [vmem:[#allocation2 + $0x98] sm:$0xff] }
  0x1b   :  { %768 = vmatpush3.bf16.msra.mxu0 %v767_v7  ;;  %v34_v18 = vrot.slane %v33_v16, 2  ;;  %v40_v19 = vadd.f32 %v39_v17, %v38_v12  ;;  %v788_v62 = vpack.c.bf16 %v196_v61, %v195_v60  ;;  %v791_v3 = vpack.c.bf16 %v198_v2, %v197_v63  ;;  %v199_v4 = vld [vmem:[#allocation2 + $0xa0] sm:$0xff]  ;;  %v200_v5 = vld [vmem:[#allocation2 + $0xa8] sm:$0xff]  ;;  %v201_v7 = vld [vmem:[#allocation2 + $0xb0] sm:$0xff] }
  0x1c   :  { %769 = vmatprep.subr.bf16.mxu0 %v925_v0  ;;  %v794_v6 = vpack.c.bf16 %v200_v5, %v199_v4  ;;  %v202_v8 = vld [vmem:[#allocation2 + $0xb8] sm:$0xff]  ;;  %v204_v11 = vld [vmem:[#allocation2 + $0xc8] sm:$0xff] }
  0x1d   :  { %v35_v23 = vadd.f32 %v34_v18, %v33_v16  ;;  %v41_v24 = vrot.slane %v40_v19, 2  ;;  %789 = vmatpush3.bf16.msra.mxu1 %v788_v62  ;;  %v797_v9 = vpack.c.bf16 %v202_v8, %v201_v7  ;;  %v206_v14 = vld [vmem:[#allocation2 + $0xd8] sm:$0xff]  ;;  %v207_v16 = vld [vmem:[#allocation2 + $0xe0] sm:$0xff]  ;;  %v208_v17 = vld [vmem:[#allocation2 + $0xe8] sm:$0xff] }
  0x1e   :  { %790 = vmatprep.subr.bf16.mxu1 %v925_v0  ;;  %v806_v18 = vpack.c.bf16 %v208_v17, %v207_v16  ;;  %v322_v62 = vld [vmem:[#allocation2 + $0x100] sm:$0xff]  ;;  %v323_v63 = vld [vmem:[#allocation2 + $0x108] sm:$0xff]  ;;  %v325_v4 = vld [vmem:[#allocation2 + $0x118] sm:$0xff] }
  0x1f   :  { %771 = vmatpush3.bf16.msra.mxu0 %v770_v13  ;;  %v36_v25 = vrot.slane %v35_v23, 1  ;;  %v42_v26 = vadd.f32 %v41_v24, %v40_v19  ;;  %v205_v13 = vld [vmem:[#allocation2 + $0xd0] sm:$0xff]  ;;  %v812_v2 = vpack.c.bf16 %v323_v63, %v322_v62  ;;  %v327_v7 = vld [vmem:[#allocation2 + $0x128] sm:$0xff]  ;;  %v334_v17 = vld [vmem:[#allocation2 + $0x160] sm:$0xff] }
  0x20   :  { %772 = vmatprep.subr.bf16.mxu0 %v925_v0  ;;  %v803_v15 = vpack.c.bf16 %v206_v14, %v205_v13  ;;  %v209_v19 = vld [vmem:[#allocation2 + $0xf0] sm:$0xff] }
  0x21   :  { %v37_v30 = vadd.f32 %v36_v25, %v35_v23  ;;  %v43_v31 = vrot.slane %v42_v26, 1  ;;  %792 = vmatpush3.bf16.msra.mxu1 %v791_v3  ;;  %v87_v23 = vrot.slane %v983_v48, %v86_v22  ;;  %v324_v3 = vld [vmem:[#allocation2 + $0x110] sm:$0xff] }
  0x22   :  { %793 = vmatprep.subr.bf16.mxu1 %v925_v0  ;;  %v815_v5 = vpack.c.bf16 %v325_v4, %v324_v3  ;;  %v332_v14 = vld [vmem:[#allocation2 + $0x150] sm:$0xff]  ;;  %v449_v3 = vld [vmem:[#allocation2 + $0x180] sm:$0xff]  ;;  %v450_v4 = vld [vmem:[#allocation2 + $0x188] sm:$0xff] }
  0x23   :  { %774 = vmatpush3.bf16.msra.mxu0 %v773_v20  ;;  %v44_v32 = vadd.f32 %v43_v31, %v42_v26  ;;  %v45_v33 = vmul.f32 0.125, %v37_v30  ;;  %v210_v20 = vld [vmem:[#allocation2 + $0xf8] sm:$0xff] }
  0x24   :  { %775 = vmatprep.subr.bf16.mxu0 %v925_v0  ;;  %v809_v21 = vpack.c.bf16 %v210_v20, %v209_v19  ;;  %v336_v19 = vld [vmem:[#allocation2 + $0x170] sm:$0xff] }
  0x25   :  { %v46_v37 = vmul.f32 0.125, %v44_v32  ;;  %v47_v38 = vmul.f32 %v45_v33, %v45_v33  ;;  %795 = vmatpush3.bf16.msra.mxu1 %v794_v6  ;;  %v326_v6 = vld [vmem:[#allocation2 + $0x120] sm:$0xff] }
  0x26   :  { %796 = vmatprep.subr.bf16.mxu1 %v925_v0  ;;  %v818_v8 = vpack.c.bf16 %v327_v7, %v326_v6  ;;  %v451_v6 = vld [vmem:[#allocation2 + $0x190] sm:$0xff]  ;;  %v452_v7 = vld [vmem:[#allocation2 + $0x198] sm:$0xff] }
  0x27   :  { %777 = vmatpush3.bf16.msra.mxu0 %v776_v27  ;;  %v48_v39 = vsub.f32 %v46_v37, %v47_v38 }
  0x28   :  { %778 = vmatprep.subr.bf16.mxu0 %v925_v0 }
  0x29   :  { %v49_v43 = vmax.f32 %v48_v39, 0.0  ;;  %798 = vmatpush3.bf16.msra.mxu1 %v797_v9  ;;  %v328_v9 = vld [vmem:[#allocation2 + $0x130] sm:$0xff] }
  0x2a   :  { %799 = vmatprep.subr.bf16.mxu1 %v925_v0 }
  0x2b   :  { %780 = vmatpush3.bf16.msra.mxu0 %v779_v34  ;;  %v50_v44 = vadd.f32 1e-05, %v49_v43 }
  0x2c   :  { %781 = vmatprep.subr.bf16.mxu0 %v925_v0 }
  0x2d   :  { %866 = vrsqrt.f32 %v50_v44 }
  0x2f   :  { %783 = vmatpush3.bf16.msra.mxu0 %v782_v40 }
  0x30   :  { %784 = vmatprep.subr.bf16.mxu0 %v925_v0 }
  0x33   :  { %786 = vmatpush3.bf16.msra.mxu0 %v785_v45 }
  0x34   :  { %811 = vmatprep.subr.bf16.mxu0 %v925_v0 }
  0x37   :  { %v867_v50 = vpop.eup %866 }
  0x38   :  { %v52_v51 = vmul.f32 %v867_v50, %v983_v48 }
  0x3a   :  { %v53_v52 = vmul.f32 %v52_v51, %v45_v33  ;;  %v61_v53 = vrot.slane %v52_v51, %v60_v49  ;;  %v186_v51 = vsub.s32 3, %v978_v47 }
  0x3c   :  { %v55_v54 = vrot.slane %v53_v52, 7  ;;  %v62_v57 = vmul.f32 %v61_v53, %v29_v10  ;;  %v203_v10 = vld [vmem:[#allocation2 + $0xc0] sm:$0xff] }
  0x3d   :  { %v800_v12 = vpack.c.bf16 %v204_v11, %v203_v10  ;;  %v330_v11 = vld [vmem:[#allocation2 + $0x140] sm:$0xff] }
  0x3e   :  { %v57_v56 = vsub.f32 %v983_v48, %v55_v54 }
  0x3f   :  { %801 = vmatpush3.bf16.msra.mxu1 %v800_v12  ;;  %v331_v12 = vld [vmem:[#allocation2 + $0x148] sm:$0xff] }
  0x40   :  { %v66_v58 = vrot.slane %v57_v56, %v65_v55  ;;  %802 = vmatprep.subr.bf16.mxu1 %v925_v0  ;;  %v191_v56 = vsub.s32 4, %v978_v47  ;;  %v824_v13 = vpack.c.bf16 %v331_v12, %v330_v11  ;;  %v456_v11 = vld [vmem:[#allocation2 + $0x1b8] sm:$0xff] }
  0x42   :  { %v67_v59 = vadd.f32 %v66_v58, %v62_v57 }
  0x43   :  { %804 = vmatpush3.bf16.msra.mxu1 %v803_v15  ;;  %v333_v15 = vld [vmem:[#allocation2 + $0x158] sm:$0xff] }
  0x44   :  { %656 = vmatmul.mubr.f32.vlgmr.msra.gmra.mrb[0].mxu0 %v67_v59  ;;  %805 = vmatprep.subr.bf16.mxu1 %v925_v0  ;;  %v827_v16 = vpack.c.bf16 %v333_v15, %v332_v14  ;;  %v458_v14 = vld [vmem:[#allocation2 + $0x1c8] sm:$0xff] }
  0x45   :  { %725 = vmatprep.mubr.msk.f32.mxu0 %vm926_vm0, %v927_v1  ;;  %813 = vmatpush3.bf16.msra.mxu0 %v812_v2 }
  0x46   :  { %814 = vmatprep.subr.bf16.mxu0 %v925_v0 }
  0x47   :  { %807 = vmatpush3.bf16.msra.mxu1 %v806_v18  ;;  %v335_v18 = vld [vmem:[#allocation2 + $0x168] sm:$0xff] }
  0x48   :  { %808 = vmatprep.subr.bf16.mxu1 %v925_v0  ;;  %v830_v20 = vpack.c.bf16 %v335_v18, %v334_v17  ;;  %v460_v17 = vld [vmem:[#allocation2 + $0x1d8] sm:$0xff] }
  0x49   :  { %816 = vmatpush3.bf16.msra.mxu0 %v815_v5  ;;  %v836_v5 = vpack.c.bf16 %v450_v4, %v449_v3 }
  0x4a   :  { %817 = vmatprep.subr.bf16.mxu0 %v925_v0 }
  0x4b   :  { %810 = vmatpush3.bf16.msra.mxu1 %v809_v21  ;;  %v337_v21 = vld [vmem:[#allocation2 + $0x178] sm:$0xff] }
  0x4c   :  { %835 = vmatprep.subr.bf16.mxu1 %v925_v0 }
  0x4d   :  { %819 = vmatpush3.bf16.msra.mxu0 %v818_v8  ;;  %v839_v8 = vpack.c.bf16 %v452_v7, %v451_v6 }
  0x4e   :  { %820 = vmatprep.subr.bf16.mxu0 %v925_v0 }
 0x117   :  { %v154_v24 = vpop.f32.mrb[0].mxu0 }
 0x118   :  { %v155_v25 = vadd.f32 %v154_v24, %v87_v23  ;;  %v657_v26 = vpop.f32.mrb[1].mxu0  ;;  %v833_v23 = vpack.c.bf16 %v337_v21, %v336_v19  ;;  %v213_v24 = vsub.s32 5, %v978_v47  ;;  %v461_v19 = vld [vmem:[#allocation2 + $0x1e0] sm:$0xff] }
 0x11a   :  { %v158_v27 = vrot.slane %v155_v25, 4  ;;  %v164_v28 = vmul.f32 %v155_v25, %v155_v25 }
 0x11c   :  { %v159_v29 = vadd.f32 %v158_v27, %v155_v25  ;;  %v165_v30 = vrot.slane %v164_v28, 4 }
 0x11e   :  { %v160_v31 = vrot.slane %v159_v29, 2  ;;  %v166_v32 = vadd.f32 %v165_v30, %v164_v28 }
 0x120   :  { %v161_v33 = vadd.f32 %v160_v31, %v159_v29  ;;  %v167_v34 = vrot.slane %v166_v32, 2 }
 0x122   :  { %v162_v35 = vrot.slane %v161_v33, 1  ;;  %v168_v36 = vadd.f32 %v167_v34, %v166_v32 }
 0x124   :  { %v163_v37 = vadd.f32 %v162_v35, %v161_v33  ;;  %v169_v38 = vrot.slane %v168_v36, 1 }
 0x126   :  { %v170_v39 = vadd.f32 %v169_v38, %v168_v36  ;;  %v171_v40 = vmul.f32 0.125, %v163_v37 }
 0x128   :  { %v172_v41 = vmul.f32 0.125, %v170_v39  ;;  %v173_v42 = vmul.f32 %v171_v40, %v171_v40 }
 0x12a   :  { %v174_v43 = vsub.f32 %v172_v41, %v173_v42 }
 0x12c   :  { %v175_v44 = vmax.f32 %v174_v43, 0.0 }
 0x12e   :  { %v176_v45 = vadd.f32 1e-05, %v175_v44 }
 0x130   :  { %868 = vrsqrt.f32 %v176_v45 }
 0x13a   :  { %v869_v46 = vpop.eup %868 }
 0x13b   :  { %v178_v50 = vmul.f32 %v869_v46, %v983_v48 }
 0x13d   :  { %v179_v52 = vmul.f32 %v178_v50, %v171_v40  ;;  %v187_v54 = vrot.slane %v178_v50, %v186_v51 }
 0x13f   :  { %v181_v53 = vrot.slane %v179_v52, 7  ;;  %v188_v58 = vmul.f32 %v187_v54, %v155_v25  ;;  %v214_v25 = vrot.slane %v983_v48, %v213_v24  ;;  %v313_v54 = vsub.s32 6, %v978_v47  ;;  %v464_v24 = vld [vmem:[#allocation2 + $0x1f8] sm:$0xff] }
 0x141   :  { %v183_v57 = vsub.f32 %v983_v48, %v181_v53 }
 0x143   :  { %v192_v59 = vrot.slane %v183_v57, %v191_v56 }
 0x145   :  { %v193_v60 = vadd.f32 %v192_v59, %v188_v58  ;;  %v318_v59 = vsub.s32 7, %v978_v47 }
 0x147   :  { %v194_v61 = vmax.f32 %v193_v60, 0.0 }
 0x149   :  { %691 = vmatmul.mubr.f32.vlgmr.msra.gmra.mrb[0].mxu1 %v194_v61 }
 0x14a   :  { %760 = vmatprep.mubr.msk.f32.mxu1 %vm926_vm0, %v927_v1  ;;  %v329_v1 = vld [vmem:[#allocation2 + $0x138] sm:$0xff]  ;;  %837 = vmatpush3.bf16.msra.mxu1 %v836_v5 }
 0x14b   :  { %v821_v10 = vpack.c.bf16 %v329_v1, %v328_v9  ;;  %838 = vmatprep.subr.bf16.mxu1 %v925_v0  ;;  %v453_v9 = vld [vmem:[#allocation2 + $0x1a0] sm:$0xff]  ;;  %v454_v1 = vld [vmem:[#allocation2 + $0x1a8] sm:$0xff] }
 0x14d   :  { %822 = vmatpush3.bf16.msra.mxu0 %v821_v10  ;;  %v455_v10 = vld [vmem:[#allocation2 + $0x1b0] sm:$0xff] }
 0x14e   :  { %823 = vmatprep.subr.bf16.mxu0 %v925_v0  ;;  %840 = vmatpush3.bf16.msra.mxu1 %v839_v8  ;;  %v845_v12 = vpack.c.bf16 %v456_v11, %v455_v10 }
 0x14f   :  { %841 = vmatprep.subr.bf16.mxu1 %v925_v0 }
 0x151   :  { %825 = vmatpush3.bf16.msra.mxu0 %v824_v13  ;;  %v457_v13 = vld [vmem:[#allocation2 + $0x1c0] sm:$0xff] }
 0x152   :  { %826 = vmatprep.subr.bf16.mxu0 %v925_v0  ;;  %v848_v15 = vpack.c.bf16 %v458_v14, %v457_v13 }
 0x155   :  { %828 = vmatpush3.bf16.msra.mxu0 %v827_v16  ;;  %v459_v16 = vld [vmem:[#allocation2 + $0x1d0] sm:$0xff] }
 0x156   :  { %829 = vmatprep.subr.bf16.mxu0 %v925_v0  ;;  %v851_v18 = vpack.c.bf16 %v460_v17, %v459_v16 }
 0x159   :  { %831 = vmatpush3.bf16.msra.mxu0 %v830_v20  ;;  %v462_v20 = vld [vmem:[#allocation2 + $0x1e8] sm:$0xff] }
 0x15a   :  { %832 = vmatprep.subr.bf16.mxu0 %v925_v0  ;;  %v854_v21 = vpack.c.bf16 %v462_v20, %v461_v19 }
 0x15d   :  { %834 = vmatpush3.bf16.msra.mxu0 %v833_v23  ;;  %v463_v23 = vld [vmem:[#allocation2 + $0x1f0] sm:$0xff] }
 0x21c   :  { %v281_v26 = vpop.f32.mrb[0].mxu1 }
 0x21d   :  { %v282_v27 = vadd.f32 %v281_v26, %v214_v25  ;;  %v692_v28 = vpop.f32.mrb[1].mxu1  ;;  %v857_v25 = vpack.c.bf16 %v464_v24, %v463_v23  ;;  %v31_v26 = vld [vmem:[%s1060_s2 + $0x8] sm:$0xff]  ;;  %s928_s2 = smov [#allocation5]  }
 0x21e   :  { %s546_s30 = sshll.u32 %s928_s2, 4  ;;  %s547_s30 = int_to_ptr.vmem [resolvable:$true] %s546_s30 }
 0x21f   :  { %v285_v29 = vrot.slane %v282_v27, 4  ;;  %v291_v30 = vmul.f32 %v282_v27, %v282_v27  ;;  %s896_s4 = scalar_lea.vmem %s547_s30, 128  ;;  %p901_p9 = scmp.lt.s32.totalorder %s547_s30, %s547_s30 }
 0x220   :  { %p897_p8 = scmp.ne.s32.totalorder %s547_s30, %s896_s4  ;;  %p902_p10 = scmp.lt.s32.totalorder %s896_s4, %s896_s4 }
 0x221   :  { %v286_v31 = vadd.f32 %v285_v29, %v282_v27  ;;  %v292_v32 = vrot.slane %v291_v30, 4 }
 0x222   :  { %p903_p11 = por %p902_p10, %p901_p9 }
 0x223   :  { %v287_v33 = vrot.slane %v286_v31, 2  ;;  %v293_v34 = vadd.f32 %v292_v32, %v291_v30 }
 0x224   :  { %p904_p12 = pnand %p903_p11, %p897_p8 }
 0x225   :  { %v288_v35 = vadd.f32 %v287_v33, %v286_v31  ;;  %v294_v36 = vrot.slane %v293_v34, 2 }
 0x227   :  { %v289_v37 = vrot.slane %v288_v35, 1  ;;  %v295_v38 = vadd.f32 %v294_v36, %v293_v34 }
 0x229   :  { %v290_v39 = vadd.f32 %v289_v37, %v288_v35  ;;  %v296_v40 = vrot.slane %v295_v38, 1 }
 0x22b   :  { %v297_v41 = vadd.f32 %v296_v40, %v295_v38  ;;  %v298_v42 = vmul.f32 0.125, %v290_v39 }
 0x22d   :  { %v299_v43 = vmul.f32 0.125, %v297_v41  ;;  %v300_v44 = vmul.f32 %v298_v42, %v298_v42 }
 0x22f   :  { %v301_v45 = vsub.f32 %v299_v43, %v300_v44 }
 0x231   :  { %v302_v46 = vmax.f32 %v301_v45, 0.0 }
 0x233   :  { %v303_v50 = vadd.f32 1e-05, %v302_v46 }
 0x235   :  { %870 = vrsqrt.f32 %v303_v50 }
 0x23f   :  { %v871_v52 = vpop.eup %870 }
 0x240   :  { %v305_v53 = vmul.f32 %v871_v52, %v983_v48 }
 0x242   :  { %v306_v56 = vmul.f32 %v305_v53, %v298_v42  ;;  %v314_v57 = vrot.slane %v305_v53, %v313_v54 }
 0x244   :  { %v308_v58 = vrot.slane %v306_v56, 7  ;;  %v315_v61 = vmul.f32 %v314_v57, %v282_v27  ;;  %v341_v27 = vrot.slane %v31_v26, %v60_v49 }
 0x246   :  { %v310_v60 = vsub.f32 %v983_v48, %v308_v58  ;;  %v842_v48 = vpack.c.bf16 %v454_v1, %v453_v9 }
 0x248   :  { %v319_v62 = vrot.slane %v310_v60, %v318_v59  ;;  %843 = vmatpush3.bf16.msra.mxu1 %v842_v48 }
 0x249   :  { %844 = vmatprep.subr.bf16.mxu1 %v925_v0 }
 0x24a   :  { %v320_v63 = vadd.f32 %v319_v62, %v315_v61 }
 0x24c   :  { %v321_v2 = vmax.f32 %v320_v63, 0.0  ;;  %846 = vmatpush3.bf16.msra.mxu1 %v845_v12  ;;  %v468_v63 = vrot.slane %v31_v26, %v186_v51 }
 0x24d   :  { %847 = vmatprep.subr.bf16.mxu1 %v925_v0 }
 0x24e   :  { %726 = vmatmul.mubr.f32.vlgmr.msra.gmra.mrb[2].mxu0 %v321_v2 }
 0x250   :  { %849 = vmatpush3.bf16.msra.mxu1 %v848_v15 }
 0x251   :  { %850 = vmatprep.subr.bf16.mxu1 %v925_v0 }
 0x254   :  { %852 = vmatpush3.bf16.msra.mxu1 %v851_v18 }
 0x255   :  { %853 = vmatprep.subr.bf16.mxu1 %v925_v0 }
 0x258   :  { %855 = vmatpush3.bf16.msra.mxu1 %v854_v21 }
 0x259   :  { %856 = vmatprep.subr.bf16.mxu1 %v925_v0 }
 0x25c   :  { %858 = vmatpush3.bf16.msra.mxu1 %v857_v25 }
 0x321   :  { %v408_v28 = vpop.f32.mrb[2].mxu0 }
 0x322   :  { %v409_v29 = vadd.f32 %v408_v28, %v341_v27  ;;  %v727_v30 = vpop.f32.mrb[3].mxu0 }
 0x324   :  { %v412_v31 = vrot.slane %v409_v29, 4  ;;  %v418_v32 = vmul.f32 %v409_v29, %v409_v29 }
 0x326   :  { %v413_v33 = vadd.f32 %v412_v31, %v409_v29  ;;  %v419_v34 = vrot.slane %v418_v32, 4 }
 0x328   :  { %v414_v35 = vrot.slane %v413_v33, 2  ;;  %v420_v36 = vadd.f32 %v419_v34, %v418_v32 }
 0x32a   :  { %v415_v37 = vadd.f32 %v414_v35, %v413_v33  ;;  %v421_v38 = vrot.slane %v420_v36, 2 }
 0x32c   :  { %v416_v0 = vrot.slane %v415_v37, 1  ;;  %v422_v39 = vadd.f32 %v421_v38, %v420_v36 }
 0x32e   :  { %v417_v40 = vadd.f32 %v416_v0, %v415_v37  ;;  %v423_v41 = vrot.slane %v422_v39, 1 }
 0x330   :  { %v424_v42 = vadd.f32 %v423_v41, %v422_v39  ;;  %v425_v43 = vmul.f32 0.125, %v417_v40 }
 0x332   :  { %v426_v44 = vmul.f32 0.125, %v424_v42  ;;  %v427_v45 = vmul.f32 %v425_v43, %v425_v43 }
 0x334   :  { %v428_v49 = vsub.f32 %v426_v44, %v427_v45 }
 0x336   :  { %v429_v46 = vmax.f32 %v428_v49, 0.0 }
 0x338   :  { %v430_v50 = vadd.f32 1e-05, %v429_v46 }
 0x33a   :  { %872 = vrsqrt.f32 %v430_v50 }
 0x344   :  { %v873_v52 = vpop.eup %872 }
 0x345   :  { %v432_v53 = vmul.f32 %v873_v52, %v31_v26 }
 0x347   :  { %v433_v54 = vmul.f32 %v432_v53, %v425_v43  ;;  %v441_v57 = vrot.slane %v432_v53, %v65_v55 }
 0x349   :  { %v435_v56 = vrot.slane %v433_v54, 7  ;;  %v442_v59 = vmul.f32 %v441_v57, %v409_v29 }
 0x34b   :  { %v437_v58 = vsub.f32 %v31_v26, %v435_v56 }
 0x34d   :  { %v446_v60 = vrot.slane %v437_v58, %v86_v22 }
 0x34f   :  { %v447_v61 = vadd.f32 %v446_v60, %v442_v59 }
 0x351   :  { %v448_v62 = vmax.f32 %v447_v61, 0.0 }
 0x353   :  { %761 = vmatmul.mubr.f32.vlgmr.msra.gmra.mrb[2].mxu1 %v448_v62 }
 0x426   :  { %v535_v2 = vpop.f32.mrb[2].mxu1 }
 0x427   :  { %v536_v3 = vadd.f32 %v535_v2, %v468_v63  ;;  %v762_v4 = vpop.f32.mrb[3].mxu1 }
 0x429   :  { %539 = vst [vmem:[#allocation5] sm:$0xff] %v536_v3 }
 0x42a   :  { %907 = shalt.err (!%p904_p12)
}
 0x42b   :  { %s908_s7 = scalar_lea.hbm %s1061_s3, 128 }
 0x42c   :  { %p909_p13 = scmp.ne.s32.totalorder %s1061_s3, %s908_s7  ;;  %p912_p0 = scmp.lt.u32.totalorder %s908_s7, %s1061_s3 }
 0x42e   :  { %p914_p1 = pnand %p912_p0, %p909_p13 }
 0x430   :  { %917 = shalt.err (!%p914_p1)
}
 0x431   :  { %549 = dma.vmem_to_hbm [thread:$0]  %s547_s30, 128, %s1061_s3, [#allocation4]  }
 0x432   :  { %920 = dma.done.wait [#allocation4], 128  }
 0x433   :  { %921 = vsyncadd [#allocation4], 4294967168 }
 0x434   :  { %553 = vsyncpa [#allocation3], 1 }
 0x435   :  { %554 = vsyncpa [#allocation4], 1 }

</bundles_post_ra>
